<compile_context>
chip_gen: v6e
topology: v6e:2x2x1
jax: 0.10.0
libtpu: 0.0.40
codegen_flags: <defaults>
</compile_context>

<pallas_src>
import functools

import jax
import jax.numpy as jnp
from jax.experimental import pallas as pl
from jax.experimental.pallas import tpu as pltpu


def _stcell_kernel(adjT_ref, x_ref, w_ref, b_ref, out_ref, *, num_hops, B, C, F, N):
    AT = adjT_ref[...]                     # (2N, 2N) bf16, pre-normalized A^T
    x = x_ref[...]                         # (B*C, 2N) f32, rows indexed (b, c)

    acc = None
    # Static unroll is fine while num_hops is small; switch to lax.fori_loop with
    # (x, acc) carries if the hop count grows.
    for h in range(num_hops):
        # gcn_onehop: x_new[(b,c), v] = sum_w A[v, w] * x[(b,c), w]  ==  x @ A^T
        x = jnp.dot(x.astype(jnp.bfloat16), AT,
                    preferred_element_type=jnp.float32)               # (B*C, 2N) f32
        # Keep vertex segment init_index=1 and lane-concatenate batches -> (C, B*N).
        xs = jnp.concatenate(
            [x[b * C:(b + 1) * C, N:2 * N] for b in range(B)], axis=1)
        # GLU: folded (1x1 conv + BN) affine as one matmul over all batches.
        y = jnp.dot(w_ref[h], xs.astype(jnp.bfloat16),
                    preferred_element_type=jnp.float32) + b_ref[h]    # (2F, B*N)
        g = y[:F, :] * jax.nn.sigmoid(y[F:, :])                       # (F, B*N)
        acc = g if acc is None else jnp.maximum(acc, g)

    out_ref[...] = acc


def stcell_forward(adj_first_list, adj_second_list, adj_mask_list, data, params,
                   *, N, dilated_num, use_mask, num_hops):
    # Mixed ops (ONE_PATH_FIXED): select first candidate from each list.
    adj = adj_first_list[0] + adj_second_list[0]
    if use_mask:
        adj = adj + adj_mask_list[0]
    # Batch-independent adjacency work done ONCE in the wrapper.
    # NOTE: like the PyTorch module, no epsilon -- a zero row sum produces inf/NaN.
    adj = adj / jnp.sum(adj, axis=-1, keepdims=True)
    adjT = adj.T.astype(jnp.bfloat16)                                 # (2N, 2N)
    V2 = 2 * N

    # data_long = cat(data[:, :, 0:N], data[:, :, d*N:(d+1)*N], dim=2) -> (B, C, 2N)
    data_long = jnp.concatenate(
        [data[:, :, 0:N], data[:, :, dilated_num * N:(dilated_num + 1) * N]], axis=2)
    B, C, _ = data_long.shape
    x2 = data_long.reshape(B * C, V2)                                 # rows = (b, c)

    W_eff, b_eff = params                                             # (H, 2F, C), (H, 2F, 1)
    F_out = W_eff.shape[1] // 2
    W_bf16 = W_eff.astype(jnp.bfloat16)

    kernel = functools.partial(_stcell_kernel, num_hops=num_hops,
                               B=B, C=C, F=F_out, N=N)

    out_slab = pl.pallas_call(
        kernel,
        out_shape=jax.ShapeDtypeStruct((F_out, B * N), jnp.float32),
        grid=(1,),
        in_specs=[
            pl.BlockSpec((V2, V2), lambda i: (0, 0)),                 # A^T (bf16)
            pl.BlockSpec((B * C, V2), lambda i: (0, 0)),              # data slab
            pl.BlockSpec((num_hops, 2 * F_out, C), lambda i: (0, 0, 0)),
            pl.BlockSpec((num_hops, 2 * F_out, 1), lambda i: (0, 0, 0)),
        ],
        out_specs=pl.BlockSpec((F_out, B * N), lambda i: (0, 0)),
        compiler_params=pltpu.CompilerParams(dimension_semantics=("arbitrary",)),
    )(adjT, x2, W_bf16, b_eff)

    # (F, B*N) lane-dense slab -> (B, F, N)
    return out_slab.reshape(F_out, B, N).transpose(1, 0, 2)


def init_params(key, num_hops, C, F, eps=1e-5):
    """Per-hop GLU params: Conv2d(C -> 2F, 1x1, xavier_uniform, zero bias) folded
    with inference-mode BatchNorm2d (gamma=1, beta=0, mean=0, var=1)."""
    Ws, bs = [], []
    for _ in range(num_hops):
        key, sub = jax.random.split(key)
        bound = (6.0 / (C + 2 * F)) ** 0.5          # xavier_uniform for (2F, C, 1, 1)
        W = jax.random.uniform(sub, (2 * F, C), jnp.float32, -bound, bound)
        b = jnp.zeros((2 * F,), jnp.float32)
        gamma = jnp.ones((2 * F,), jnp.float32)
        beta = jnp.zeros((2 * F,), jnp.float32)
        mean = jnp.zeros((2 * F,), jnp.float32)
        var = jnp.ones((2 * F,), jnp.float32)
        scale = gamma / jnp.sqrt(var + eps)
        Ws.append(W * scale[:, None])
        bs.append((scale * (b - mean) + beta)[:, None])
    return jnp.stack(Ws), jnp.stack(bs)


def stcell_reference(adj_first_list, adj_second_list, adj_mask_list, data, params,
                     *, N, dilated_num, use_mask, num_hops):
    """Pure-JAX mirror of the PyTorch forward (for a correctness check)."""
    adj = adj_first_list[0] + adj_second_list[0]
    if use_mask:
        adj = adj + adj_mask_list[0]
    adj = adj / jnp.sum(adj, axis=-1, keepdims=True)
    data_long = jnp.concatenate(
        [data[:, :, 0:N], data[:, :, dilated_num * N:(dilated_num + 1) * N]], axis=2)
    W_eff, b_eff = params
    F_out = W_eff.shape[1] // 2
    x = data_long
    outs = []
    for h in range(num_hops):
        x = jnp.einsum('vw,ncw->ncv', adj, x)
        xs = x[:, :, 1 * N:2 * N]                                    # init_index = 1
        y = jnp.einsum('fc,ncv->nfv', W_eff[h], xs) + b_eff[h][None]
        outs.append(y[:, :F_out] * jax.nn.sigmoid(y[:, F_out:]))
    return jnp.max(jnp.stack(outs, 0), axis=0)


if __name__ == "__main__":
    B, C, N, F = 2, 4, 8, 8          # batch, num_of_features, num_of_vertices, filters[-1]
    num_hops = 2
    dilated_num = 1
    use_mask = True
    V2 = 2 * N
    V_total = 4 * N                  # data holds several N-sized vertex segments

    key = jax.random.PRNGKey(0)
    k1, k2, k3, k4, kp = jax.random.split(key, 5)
    adj_first_list = [jax.random.uniform(k1, (V2, V2), jnp.float32, 0.1, 1.0)]
    adj_second_list = [jax.random.uniform(k2, (V2, V2), jnp.float32, 0.1, 1.0)]
    adj_mask_list = [jax.random.uniform(k3, (V2, V2), jnp.float32, 0.0, 0.5)]
    data = jax.random.normal(k4, (B, C, V_total), jnp.float32)

    params = init_params(kp, num_hops, C, F)

    out = stcell_forward(adj_first_list, adj_second_list, adj_mask_list, data, params,
                         N=N, dilated_num=dilated_num, use_mask=use_mask,
                         num_hops=num_hops)
    out = jax.block_until_ready(out)

    ref = stcell_reference(adj_first_list, adj_second_list, adj_mask_list, data, params,
                           N=N, dilated_num=dilated_num, use_mask=use_mask,
                           num_hops=num_hops)

    assert out.shape == (B, F, N), out.shape
    assert jnp.allclose(out, ref, rtol=2e-2, atol=2e-2), \
        f"max abs err = {jnp.max(jnp.abs(out - ref))}"
    print("KERNEL_OK")
</pallas_src>

<mosaic_0001>
module attributes {stable_mosaic.version = 11 : i64} {
  func.func @_stcell_kernel(%arg0: i32, %arg1: memref<16x16xbf16, #tpu.memory_space<vmem>>, %arg2: memref<8x16xf32, #tpu.memory_space<vmem>>, %arg3: memref<2x16x4xbf16, #tpu.memory_space<vmem>>, %arg4: memref<2x16x1xf32, #tpu.memory_space<vmem>>, %arg5: memref<8x16xf32, #tpu.memory_space<vmem>>) attributes {dimension_semantics = [#tpu.dimension_semantics<arbitrary>], iteration_bounds = array<i64: 1>, scalar_prefetch = 0 : i64, scratch_operands = 0 : i64, tpu.core_type = #tpu.core_type<tc>, window_params = [{pipeline_mode = #tpu.pipeline_mode<synchronous>, transform_indices = @transform_0, window_bounds = array<i64: 16, 16>}, {pipeline_mode = #tpu.pipeline_mode<synchronous>, transform_indices = @transform_1, window_bounds = array<i64: 8, 16>}, {pipeline_mode = #tpu.pipeline_mode<synchronous>, transform_indices = @transform_2, window_bounds = array<i64: 2, 16, 4>}, {pipeline_mode = #tpu.pipeline_mode<synchronous>, transform_indices = @transform_3, window_bounds = array<i64: 2, 16, 1>}, {pipeline_mode = #tpu.pipeline_mode<synchronous>, transform_indices = @transform_4, window_bounds = array<i64: 8, 16>}]} {
    %c0 = arith.constant 0 : index
    %c0_0 = arith.constant 0 : index
    %0 = vector.load %arg1[%c0, %c0_0] : memref<16x16xbf16, #tpu.memory_space<vmem>>, vector<16x16xbf16>
    %c0_1 = arith.constant 0 : index
    %c0_2 = arith.constant 0 : index
    %1 = vector.load %arg2[%c0_1, %c0_2] : memref<8x16xf32, #tpu.memory_space<vmem>>, vector<8x16xf32>
    %2 = arith.truncf %1 : vector<8x16xf32> to vector<8x16xbf16>
    %cst = arith.constant dense<0.000000e+00> : vector<8x16xf32>
    %3 = tpu.matmul %2, %0, %cst {dimension_numbers = #tpu.dot_dimension_numbers<[1], [0], [0], [1], [0, 0, 1, 1], [], []>} : vector<8x16xbf16>, vector<16x16xbf16>, vector<8x16xf32> -> vector<8x16xf32>
    %4 = vector.extract_strided_slice %3 {offsets = [0, 8], sizes = [4, 8], strides = [1, 1]} : vector<8x16xf32> to vector<4x8xf32>
    %5 = vector.extract_strided_slice %3 {offsets = [4, 8], sizes = [4, 8], strides = [1, 1]} : vector<8x16xf32> to vector<4x8xf32>
    %6 = tpu.concatenate %4, %5 in 1 : vector<4x8xf32>, vector<4x8xf32> -> vector<4x16xf32>
    %c0_3 = arith.constant 0 : index
    %c0_4 = arith.constant 0 : index
    %c0_5 = arith.constant 0 : index
    %7 = vector.load %arg3[%c0_3, %c0_4, %c0_5] : memref<2x16x4xbf16, #tpu.memory_space<vmem>>, vector<1x16x4xbf16>
    %8 = vector.shape_cast %7 : vector<1x16x4xbf16> to vector<16x4xbf16>
    %9 = arith.truncf %6 : vector<4x16xf32> to vector<4x16xbf16>
    %cst_6 = arith.constant dense<0.000000e+00> : vector<16x16xf32>
    %10 = tpu.matmul %8, %9, %cst_6 {dimension_numbers = #tpu.dot_dimension_numbers<[1], [0], [0], [1], [0, 0, 1, 1], [], []>} : vector<16x4xbf16>, vector<4x16xbf16>, vector<16x16xf32> -> vector<16x16xf32>
    %c0_7 = arith.constant 0 : index
    %c0_8 = arith.constant 0 : index
    %c0_9 = arith.constant 0 : index
    %11 = vector.load %arg4[%c0_7, %c0_8, %c0_9] : memref<2x16x1xf32, #tpu.memory_space<vmem>>, vector<1x16x1xf32>
    %12 = vector.shape_cast %11 : vector<1x16x1xf32> to vector<16x1xf32>
    %13 = vector.broadcast %12 : vector<16x1xf32> to vector<16x16xf32>
    %14 = arith.addf %10, %13 : vector<16x16xf32>
    %15 = vector.extract_strided_slice %14 {offsets = [0, 0], sizes = [8, 16], strides = [1, 1]} : vector<16x16xf32> to vector<8x16xf32>
    %16 = vector.extract_strided_slice %14 {offsets = [8, 0], sizes = [8, 16], strides = [1, 1]} : vector<16x16xf32> to vector<8x16xf32>
    %17 = arith.negf %16 : vector<8x16xf32>
    %18 = math.exp %17 : vector<8x16xf32>
    %cst_10 = arith.constant 1.000000e+00 : f32
    %19 = vector.broadcast %cst_10 : f32 to vector<8x16xf32>
    %20 = arith.addf %19, %18 : vector<8x16xf32>
    %21 = arith.divf %19, %20 : vector<8x16xf32>
    %22 = arith.mulf %15, %21 : vector<8x16xf32>
    %23 = arith.truncf %3 : vector<8x16xf32> to vector<8x16xbf16>
    %cst_11 = arith.constant dense<0.000000e+00> : vector<8x16xf32>
    %24 = tpu.matmul %23, %0, %cst_11 {dimension_numbers = #tpu.dot_dimension_numbers<[1], [0], [0], [1], [0, 0, 1, 1], [], []>} : vector<8x16xbf16>, vector<16x16xbf16>, vector<8x16xf32> -> vector<8x16xf32>
    %25 = vector.extract_strided_slice %24 {offsets = [0, 8], sizes = [4, 8], strides = [1, 1]} : vector<8x16xf32> to vector<4x8xf32>
    %26 = vector.extract_strided_slice %24 {offsets = [4, 8], sizes = [4, 8], strides = [1, 1]} : vector<8x16xf32> to vector<4x8xf32>
    %27 = tpu.concatenate %25, %26 in 1 : vector<4x8xf32>, vector<4x8xf32> -> vector<4x16xf32>
    %c1 = arith.constant 1 : index
    %c0_12 = arith.constant 0 : index
    %c0_13 = arith.constant 0 : index
    %28 = vector.load %arg3[%c1, %c0_12, %c0_13] : memref<2x16x4xbf16, #tpu.memory_space<vmem>>, vector<1x16x4xbf16>
    %29 = vector.shape_cast %28 : vector<1x16x4xbf16> to vector<16x4xbf16>
    %30 = arith.truncf %27 : vector<4x16xf32> to vector<4x16xbf16>
    %cst_14 = arith.constant dense<0.000000e+00> : vector<16x16xf32>
    %31 = tpu.matmul %29, %30, %cst_14 {dimension_numbers = #tpu.dot_dimension_numbers<[1], [0], [0], [1], [0, 0, 1, 1], [], []>} : vector<16x4xbf16>, vector<4x16xbf16>, vector<16x16xf32> -> vector<16x16xf32>
    %c1_15 = arith.constant 1 : index
    %c0_16 = arith.constant 0 : index
    %c0_17 = arith.constant 0 : index
    %32 = vector.load %arg4[%c1_15, %c0_16, %c0_17] : memref<2x16x1xf32, #tpu.memory_space<vmem>>, vector<1x16x1xf32>
    %33 = vector.shape_cast %32 : vector<1x16x1xf32> to vector<16x1xf32>
    %34 = vector.broadcast %33 : vector<16x1xf32> to vector<16x16xf32>
    %35 = arith.addf %31, %34 : vector<16x16xf32>
    %36 = vector.extract_strided_slice %35 {offsets = [0, 0], sizes = [8, 16], strides = [1, 1]} : vector<16x16xf32> to vector<8x16xf32>
    %37 = vector.extract_strided_slice %35 {offsets = [8, 0], sizes = [8, 16], strides = [1, 1]} : vector<16x16xf32> to vector<8x16xf32>
    %38 = arith.negf %37 : vector<8x16xf32>
    %39 = math.exp %38 : vector<8x16xf32>
    %cst_18 = arith.constant 1.000000e+00 : f32
    %40 = vector.broadcast %cst_18 : f32 to vector<8x16xf32>
    %41 = arith.addf %40, %39 : vector<8x16xf32>
    %42 = arith.divf %40, %41 : vector<8x16xf32>
    %43 = arith.mulf %36, %42 : vector<8x16xf32>
    %44 = arith.maximumf %22, %43 : vector<8x16xf32>
    %c0_19 = arith.constant 0 : index
    %c0_20 = arith.constant 0 : index
    %45 = vector.load %arg5[%c0_19, %c0_20] : memref<8x16xf32, #tpu.memory_space<vmem>>, vector<8x16xf32>
    tpu.vector_store %arg5[%c0_19, %c0_20], %44 {strides = array<i32>} : memref<8x16xf32, #tpu.memory_space<vmem>>, vector<8x16xf32>,
    return
  }
  func.func @transform_0(%arg0: i32) -> (i32, i32) {
    %c0_i32 = arith.constant 0 : i32
    %c0_i32_0 = arith.constant 0 : i32
    %c0_i32_1 = arith.constant 0 : i32
    return %c0_i32, %c0_i32_0 : i32, i32
  }
  func.func @transform_1(%arg0: i32) -> (i32, i32) {
    %c0_i32 = arith.constant 0 : i32
    %c0_i32_0 = arith.constant 0 : i32
    %c0_i32_1 = arith.constant 0 : i32
    return %c0_i32, %c0_i32_0 : i32, i32
  }
  func.func @transform_2(%arg0: i32) -> (i32, i32, i32) {
    %c0_i32 = arith.constant 0 : i32
    %c0_i32_0 = arith.constant 0 : i32
    %c0_i32_1 = arith.constant 0 : i32
    %c0_i32_2 = arith.constant 0 : i32
    return %c0_i32, %c0_i32_0, %c0_i32_1 : i32, i32, i32
  }
  func.func @transform_3(%arg0: i32) -> (i32, i32, i32) {
    %c0_i32 = arith.constant 0 : i32
    %c0_i32_0 = arith.constant 0 : i32
    %c0_i32_1 = arith.constant 0 : i32
    %c0_i32_2 = arith.constant 0 : i32
    return %c0_i32, %c0_i32_0, %c0_i32_1 : i32, i32, i32
  }
  func.func @transform_4(%arg0: i32) -> (i32, i32) {
    %c0_i32 = arith.constant 0 : i32
    %c0_i32_0 = arith.constant 0 : i32
    %c0_i32_1 = arith.constant 0 : i32
    return %c0_i32, %c0_i32_0 : i32, i32
  }
}

</mosaic_0001>

<bundles_post_ra>
// kernel: tpu_custom_call.1
= control target key start
LH: loop header
LB: loop body
LE: loop exit
PB: predicated region body
PF: predicated region fallthrough
CT: control target
= control target key end

     0   :  { %v385_v1 = vmov 0.0   ;;  %vm29_vm0 = vcmask 130048   ;;  %vm386_vm1 = vmmov 0   ;;  %s455_s0 = inlined_call_operand.vmem [shape: bf16[16,16], index: 0, kind: input, shape index: {}]   ;;  %s456_s1 = inlined_call_operand.vmem [shape: f32[8,16], index: 1, kind: input, shape index: {}]   ;;  %s457_s2 = inlined_call_operand.vmem [shape: bf16[2,16,4], index: 2, kind: input, shape index: {}]   ;;  %s458_s3 = inlined_call_operand.vmem [shape: f32[2,16,1], index: 3, kind: input, shape index: {}]   ;;  %s459_s4 = inlined_call_operand.hbm [shape: f32[8,16], index: 4, kind: output, shape index: {}]  }
   0x1   :  { %v352_v0 = vld [vmem:[%s455_s0] sm:$0xff]   ;;  %321 = vmatprep.subr.bf16.mxu0 %v385_v1  ;;  %327 = vmatprep.subr.bf16.mxu1 %v385_v1 }
   0x2   :  { %v21_v2 = vld [vmem:[%s456_s1] sm:$0xff]  ;;  %322 = vmatpush3.bf16.msra.mxu0 %v352_v0  ;;  %323 = vmatprep.mubr.msk.bf16.mxu0 %vm386_vm1, %v385_v1 }
   0x3   :  { %v22_v3 = vpack.c.bf16 %v21_v2, %v21_v2  ;;  %333 = vmatprep.subr.bf16.mxu0 %v385_v1  ;;  %329 = vmatprep.mubr.msk.bf16.mxu1 %vm386_vm1, %v385_v1 }
   0x4   :  { %9 = vsyncpa [#allocation3], 0  ;;  %s387_s0 = smov 120   ;;  %vm79_vm2 = vcmask 64512   ;;  %vm105_vm3 = vcmask 1041408   ;;  %v353_v14 = vld [vmem:[%s457_s2] sm:$0xff]  }
   0x5   :  { %324 = vmatmul.mubr.msk.bf16.vlgmr.msra.gmra.mxu0 %vm29_vm0, %v22_v3  ;;  %vm101_vm4 = vcmask 31744   ;;  %v85_v15 = vld [vmem:[%s458_s3 + $0x8] sm:$0xff]  ;;  %v388_v16 = vmov 0   ;;  %v309_v17 = vld [vmem:[%s458_s3 + $0x18] sm:$0xff]  ;;  %v84_v20 = vld [vmem:[%s458_s3] sm:$0xff] }
   0x6   :  { %334 = vmatpush3.bf16.msra.mxu0 %v352_v0  ;;  %335 = vmatprep.mubr.msk.bf16.mxu0 %vm386_vm1, %v385_v1  ;;  %v308_v21 = vld [vmem:[%s458_s3 + $0x10] sm:$0xff]  ;;  %v354_v29 = vld [vmem:[%s457_s2 + $0x8] sm:$0xff]   ;;  %s389_s2 = smov [#allocation2]  }
   0x7   :  { %350 = vset.pattern.permute.xlu1 %v388_v16  ;;  %351 = vset.pattern.permute.xlu0 %v388_v16  ;;  %s292_s3 = sshll.u32 %s389_s2, 4  ;;  %s293_s3 = int_to_ptr.vmem [resolvable:$true] %s292_s3 }
   0x8   :  { %93 = vperm.xlu1 %350, %v85_v15   ;;  %s363_s30 = scalar_lea.vmem %s293_s3, 128  ;;  %p368_p1 = scmp.lt.s32.totalorder %s293_s3, %s293_s3 }
   0x9   :  { %p364_p0 = scmp.ne.s32.totalorder %s293_s3, %s363_s30  ;;  %p369_p2 = scmp.lt.s32.totalorder %s363_s30, %s363_s30 }
   0xb   :  { %p370_p3 = por %p369_p2, %p368_p1 }
   0xc   :  { %222 = vperm.xlu1 %350, %v309_v17  }
   0xd   :  { %p371_p4 = pnand %p370_p3, %p364_p0 }
  0x10   :  { %217 = vperm.xlu1 %350, %v308_v21  }
  0x83   :  { %v94_v32 = vpop.permute.xlu1 %93 }
  0x87   :  { %v223_v45 = vpop.permute.xlu1 %222 }
  0x8b   :  { %v218_v52 = vpop.permute.xlu1 %217 }
  0xc5   :  { %v67_v4 = vpop.f32.mrf.mxu0 }
  0xc6   :  { %v157_v5 = vpack.c.bf16 %v67_v4, %v67_v4  ;;  %74 = vrot.lane.b32.xlu0 %v67_v4, %s387_s0  ;;  %v77_v9 = vrot.slane %v67_v4, 4 }
  0xc7   :  { %v325_v6 = vpop.f32.mrf.mxu0 }
  0xc8   :  { %336 = vmatmul.mubr.msk.bf16.vlgmr.msra.gmra.mxu0 %vm29_vm0, %v157_v5 }
  0xc9   :  { %v70_v7 = vpop.f32.mrf.mxu0 }
  0xcb   :  { %v326_v8 = vpop.f32.mrf.mxu0 }
 0x138   :  { %v75_v10 = vpop.permute.xlu0 %74 }
 0x139   :  { %v80_v11 = vsel %vm79_vm2, %v75_v10, %v77_v9 }
 0x13a   :  { %v83_v12 = vpack.c.bf16 %v80_v11, %v80_v11 }
 0x13c   :  { %v107_v13 = vsel %vm105_vm3, %v83_v12, 0 }
 0x13d   :  { %328 = vmatpush3.bf16.msra.mxu1 %v107_v13 }
 0x13e   :  { %339 = vmatprep.subr.bf16.mxu1 %v385_v1 }
 0x140   :  { %330 = vmatmul.mubr.msk.bf16.vlgmr.msra.gmra.mxu1 %vm101_vm4, %v353_v14 }
 0x141   :  { %341 = vmatprep.mubr.msk.bf16.mxu1 %vm386_vm1, %v385_v1 }
 0x188   :  { %v195_v18 = vpop.f32.mrf.mxu0 }
 0x189   :  { %202 = vrot.lane.b32.xlu0 %v195_v18, %s387_s0  ;;  %v205_v24 = vrot.slane %v195_v18, 4 }
 0x18a   :  { %v337_v19 = vpop.f32.mrf.mxu0 }
 0x18c   :  { %v198_v22 = vpop.f32.mrf.mxu0 }
 0x18d   :  { %88 = vperm.xlu0 %351, %v84_v20  }
 0x18e   :  { %v338_v23 = vpop.f32.mrf.mxu0 }
 0x1fb   :  { %v203_v25 = vpop.permute.xlu0 %202 }
 0x1fc   :  { %v207_v26 = vsel %vm79_vm2, %v203_v25, %v205_v24 }
 0x1fd   :  { %v211_v27 = vpack.c.bf16 %v207_v26, %v207_v26 }
 0x1ff   :  { %v234_v28 = vsel %vm105_vm3, %v211_v27, 0 }
 0x200   :  { %340 = vmatpush3.bf16.msra.mxu1 %v234_v28  ;;  %v143_v30 = vpop.f32.mrf.mxu1 }
 0x202   :  { %v331_v31 = vpop.f32.mrf.mxu1 }
 0x203   :  { %342 = vmatmul.mubr.msk.bf16.vlgmr.msra.gmra.mxu1 %vm101_vm4, %v354_v29 }
 0x204   :  { %v146_v33 = vpop.f32.mrf.mxu1 }
 0x205   :  { %v147_v34 = vadd.f32 %v146_v33, %v94_v32 }
 0x206   :  { %v332_v35 = vpop.f32.mrf.mxu1 }
 0x207   :  { %v304_v36 = vmul.f32 -1.442695, %v147_v34 }
 0x208   :  { %v89_v39 = vpop.permute.xlu0 %88 }
 0x209   :  { %355 = vpow2.f32 %v304_v36  ;;  %v144_v40 = vadd.f32 %v143_v30, %v89_v39 }
 0x216   :  { %v356_v37 = vpop.eup %355 }
 0x217   :  { %v153_v38 = vadd.f32 1.0, %v356_v37 }
 0x219   :  { %357 = vrcp.f32 %v153_v38 }
 0x226   :  { %v358_v41 = vpop.eup %357 }
 0x227   :  { %v156_v42 = vmul.f32 %v358_v41, %v144_v40 }
 0x2c3   :  { %v270_v43 = vpop.f32.mrf.mxu1 }
 0x2c4   :  { %v271_v53 = vadd.f32 %v270_v43, %v218_v52 }
 0x2c5   :  { %v343_v44 = vpop.f32.mrf.mxu1 }
 0x2c7   :  { %v273_v46 = vpop.f32.mrf.mxu1 }
 0x2c8   :  { %v274_v47 = vadd.f32 %v273_v46, %v223_v45 }
 0x2c9   :  { %v344_v48 = vpop.f32.mrf.mxu1 }
 0x2ca   :  { %v312_v49 = vmul.f32 -1.442695, %v274_v47 }
 0x2cc   :  { %359 = vpow2.f32 %v312_v49 }
 0x2d9   :  { %v360_v50 = vpop.eup %359 }
 0x2da   :  { %v280_v51 = vadd.f32 1.0, %v360_v50 }
 0x2dc   :  { %361 = vrcp.f32 %v280_v51 }
 0x2e9   :  { %v362_v54 = vpop.eup %361 }
 0x2ea   :  { %v283_v55 = vmul.f32 %v362_v54, %v271_v53 }
 0x2ec   :  { %v284_v56 = vmax.f32 %v156_v42, %v283_v55 }
 0x2ee   :  { %285 = vst.msk [vmem:[#allocation2] sm:$0xff] %vm29_vm0, %v284_v56 }
 0x2ef   :  { %374 = shalt.err (!%p371_p4)
}
 0x2f0   :  { %295 = dma.vmem_to_hbm [thread:$0]  %s293_s3, 128, %s459_s4, [#allocation3]  }
 0x2f1   :  { %383 = dma.done.wait [#allocation3], 128  }
 0x2f2   :  { %384 = vsyncadd [#allocation3], 4294967168 }
 0x2f3   :  { %299 = vsyncpa [#allocation3], 1 }

</bundles_post_ra>
